<compile_context>
chip_gen: v7x
topology: tpu7x:2x2x1
jax: 0.10.0
libtpu: 0.0.40
codegen_flags: <defaults>
</compile_context>

<pallas_src>
import functools

import jax
import jax.numpy as jnp
from jax.experimental import pallas as pl
from jax.experimental.pallas import tpu as pltpu

# int8 bit type (signed)
QMIN = -128.0
QMAX = 127.0

_LANE_CANDIDATES = (1024, 512, 256, 128)


# ----------------------------------------------------------------------------- #
# Generation-aware knobs
# ----------------------------------------------------------------------------- #
def _tpu_generation_defaults():
    """Returns (target_block_bytes, pipeline_vmem_limit, fused_vmem_limit, fused_max_input_bytes)."""
    kind = ""
    try:
        kind = jax.devices()[0].device_kind.lower()
    except Exception:
        pass
    if "v7" in kind or "7x" in kind:
        # v7x: 3.2 TB/s HBM makes the per-step overhead visible -> 8 MiB blocks;
        # in+out double-buffered ~= 32 MiB, so raise scoped VMEM to 48 MiB (64 MiB physical).
        return 8 << 20, 48 << 20, 48 << 20, 4 << 20
    if "v6" in kind:
        # v6e: 4 MiB blocks -> 16 MiB pipeline buffers, inside the 32 MiB scoped default.
        return 4 << 20, None, 64 << 20, 8 << 20
    # v5e / unknown: conservative (v5e scoped default is 16 MiB).
    return 2 << 20, None, 64 << 20, 4 << 20


def _compiler_params(semantics, vmem_limit):
    if vmem_limit is None:
        return pltpu.CompilerParams(dimension_semantics=semantics)
    return pltpu.CompilerParams(dimension_semantics=semantics,
                                vmem_limit_bytes=int(vmem_limit))


# ----------------------------------------------------------------------------- #
# Layout helpers
# ----------------------------------------------------------------------------- #
def _lane_dense_2d(x):
    """Lane-dense 2D view of an elementwise tensor. Returns (x2d, n_padded_elements)."""
    total = x.size
    for lane in _LANE_CANDIDATES:
        if total % lane == 0:
            return x.reshape(total // lane, lane), 0
    # Fallback: pad the flattened tensor to a multiple of 128 with *edge* values
    # (min/max invariant, so the observer stays exact). Keeps stores lane-dense/unmasked
    # on the hot fake-quant path; padded elements are sliced off afterwards.
    flat = x.reshape(-1)
    pad = (-total) % 128
    flat = jnp.pad(flat, (0, pad), mode="edge")
    return flat.reshape(-1, 128), pad


def _sublane_pack(itemsize):
    return {1: 32, 2: 16}.get(itemsize, 8)


def _choose_row_tile(n_rows, lane, itemsize, target_bytes):
    """Row tile giving ~target_bytes per block, multiple of the sublane pack for the dtype."""
    pack = _sublane_pack(itemsize)
    rt = (target_bytes // (lane * itemsize)) // pack * pack
    rt = max(rt, pack)
    if rt >= n_rows:
        return n_rows  # single full-extent block (always a legal block shape)
    return rt


# ----------------------------------------------------------------------------- #
# Kernel 1: layer-wise min/max observer (reduction over the whole tensor)
# ----------------------------------------------------------------------------- #
def _minmax_kernel(x_ref, min_ref, max_ref, mn_acc, mx_acc, *,
                   n_rows, needs_mask, acc_rows, blocks_per_split):
    rt, lane = x_ref.shape
    n_sub = rt // acc_rows
    s = pl.program_id(0)   # split (core) axis
    t = pl.program_id(1)   # streaming axis within the split

    @pl.when(t == 0)
    def _():
        mn_acc[...] = jnp.full_like(mn_acc, jnp.inf)
        mx_acc[...] = jnp.full_like(mx_acc, -jnp.inf)

    def accumulate(masked):
        # Stream the block in (acc_rows, lane) sub-slices: caps live f32 temporaries to a
        # few vregs (matters for sub-32-bit inputs with the larger v6e/v7x blocks) and avoids
        # the sublane-splitting reshape fold.
        def body(j):
            r0 = pl.multiple_of(j * acc_rows, acc_rows)
            xs = x_ref[pl.ds(r0, acc_rows), :].astype(jnp.float32)
            if masked:
                gb = s * blocks_per_split + t  # global block index
                row = jax.lax.broadcasted_iota(jnp.int32, (acc_rows, lane), 0)
                valid = (gb * rt + r0 + row) < n_rows
                mn_acc[...] = jnp.minimum(mn_acc[...], jnp.where(valid, xs, jnp.inf))
                mx_acc[...] = jnp.maximum(mx_acc[...], jnp.where(valid, xs, -jnp.inf))
            else:
                mn_acc[...] = jnp.minimum(mn_acc[...], xs)
                mx_acc[...] = jnp.maximum(mx_acc[...], xs)

        if n_sub == 1:
            body(0)
        else:
            @pl.loop(0, n_sub)
            def _(j):
                body(j)

    if needs_mask:
        # Only the *global last* (partial) block pays the mask tax; interior blocks run unmasked.
        is_last = jnp.logical_and(s == pl.num_programs(0) - 1,
                                  t == pl.num_programs(1) - 1)

        @pl.when(jnp.logical_not(is_last))
        def _():
            accumulate(masked=False)

        @pl.when(is_last)
        def _():
            accumulate(masked=True)
    else:
        accumulate(masked=False)

    # Full cross-lane/sublane reduction only once per split, in the epilogue.
    @pl.when(t == pl.num_programs(1) - 1)
    def _():
        min_ref[...] = jnp.full((1, 1), jnp.min(mn_acc[...]), dtype=min_ref.dtype)
        max_ref[...] = jnp.full((1, 1), jnp.max(mx_acc[...]), dtype=max_ref.dtype)


def minmax_observe(x2d, row_tile, *, pipeline_vmem_limit=None):
    R, L = x2d.shape
    n_blocks = pl.cdiv(R, row_tile)
    # Leading "parallel" split axis: sharded across TensorCores on multi-TC chips (v7x);
    # sequential and ~free on 1-TC chips. Only split when blocks chop evenly (no extra masking).
    n_splits = 2 if (n_blocks % 2 == 0 and n_blocks >= 4) else 1
    bps = n_blocks // n_splits
    pack = _sublane_pack(x2d.dtype.itemsize)
    acc_rows = pack if row_tile % pack == 0 else row_tile
    needs_mask = (R % row_tile) != 0

    kernel = functools.partial(_minmax_kernel, n_rows=R, needs_mask=needs_mask,
                               acc_rows=acc_rows, blocks_per_split=bps)

    mins, maxs = pl.pallas_call(
        kernel,
        out_shape=(
            jax.ShapeDtypeStruct((n_splits, 1), jnp.float32),
            jax.ShapeDtypeStruct((n_splits, 1), jnp.float32),
        ),
        grid_spec=pltpu.PrefetchScalarGridSpec(
            num_scalar_prefetch=0,
            grid=(n_splits, bps),
            in_specs=[pl.BlockSpec((row_tile, L), lambda s, t: (s * bps + t, 0))],
            out_specs=(
                pl.BlockSpec((1, 1), lambda s, t: (s, 0)),
                pl.BlockSpec((1, 1), lambda s, t: (s, 0)),
            ),
            scratch_shapes=[
                pltpu.VMEM((acc_rows, L), jnp.float32),
                pltpu.VMEM((acc_rows, L), jnp.float32),
            ],
        ),
        compiler_params=_compiler_params(("parallel", "arbitrary"), pipeline_vmem_limit),
        cost_estimate=pl.CostEstimate(
            flops=2 * x2d.size, transcendentals=0,
            bytes_accessed=x2d.size * x2d.dtype.itemsize + 16),
    )(x2d)
    # Tiny (n_splits, 1) partial reduction done in the wrapper.
    return jnp.min(mins), jnp.max(maxs)


# ----------------------------------------------------------------------------- #
# Kernel 2: uniform fake-quantization (elementwise hot path)
# ----------------------------------------------------------------------------- #
def _fakequant_kernel(params_ref, x_ref, o_ref):
    scale = params_ref[0]
    zp = params_ref[1]
    x = x_ref[...].astype(jnp.float32)
    # Divide (not multiply-by-reciprocal) for bit-exact parity with the reference x/scale;
    # the pass is HBM-bound so the extra elementwise work is hidden under DMA.
    q = jnp.clip(jnp.round(x / scale + zp), QMIN, QMAX)
    o_ref[...] = ((q - zp) * scale).astype(o_ref.dtype)


def fake_quant(x2d, scale, zero_point, row_tile, *, pipeline_vmem_limit=None):
    R, L = x2d.shape
    grid = (pl.cdiv(R, row_tile),)
    params = jnp.stack([jnp.asarray(scale, jnp.float32),
                        jnp.asarray(zero_point, jnp.float32)])
    # TODO(synk): expose input_output_aliases for donated activations (in-place fake-quant);
    # left off by default since aliasing a non-donated input makes XLA insert a defensive copy.
    return pl.pallas_call(
        _fakequant_kernel,
        out_shape=jax.ShapeDtypeStruct((R, L), x2d.dtype),
        grid_spec=pltpu.PrefetchScalarGridSpec(
            num_scalar_prefetch=1,  # [scale, zero_point] land in SMEM
            grid=grid,
            in_specs=[pl.BlockSpec((row_tile, L), lambda i, p: (i, 0))],
            out_specs=pl.BlockSpec((row_tile, L), lambda i, p: (i, 0)),
        ),
        compiler_params=_compiler_params(("parallel",), pipeline_vmem_limit),
        cost_estimate=pl.CostEstimate(
            flops=6 * x2d.size, transcendentals=0,
            bytes_accessed=2 * x2d.size * x2d.dtype.itemsize),
    )(params, x2d)


# ----------------------------------------------------------------------------- #
# Kernel 3: fused calibrate + quantize for VMEM-resident tensors (single HBM read)
# ----------------------------------------------------------------------------- #
def _fused_calib_quant_kernel(prev_ref, x_ref, o_ref, min_ref, max_ref, scale_ref, zp_ref):
    x = x_ref[...].astype(jnp.float32)
    mn = jnp.minimum(jnp.min(x), prev_ref[0])
    mx = jnp.maximum(jnp.max(x), prev_ref[1])
    eps = jnp.float32(jnp.finfo(jnp.float32).eps)
    scale = jnp.maximum((mx - mn) / jnp.float32(QMAX - QMIN), eps)
    zp = jnp.clip(jnp.float32(QMIN) - jnp.round(mn / scale), QMIN, QMAX)
    q = jnp.clip(jnp.round(x / scale + zp), QMIN, QMAX)
    o_ref[...] = ((q - zp) * scale).astype(o_ref.dtype)
    min_ref[...] = jnp.full((1, 1), mn, dtype=jnp.float32)
    max_ref[...] = jnp.full((1, 1), mx, dtype=jnp.float32)
    scale_ref[...] = jnp.full((1, 1), scale, dtype=jnp.float32)
    zp_ref[...] = jnp.full((1, 1), zp, dtype=jnp.float32)


def fused_calibrate_quant(x2d, prev_minmax, *, vmem_limit):
    R, L = x2d.shape
    y2d, mn, mx, scale, zp = pl.pallas_call(
        _fused_calib_quant_kernel,
        out_shape=(
            jax.ShapeDtypeStruct((R, L), x2d.dtype),
            jax.ShapeDtypeStruct((1, 1), jnp.float32),
            jax.ShapeDtypeStruct((1, 1), jnp.float32),
            jax.ShapeDtypeStruct((1, 1), jnp.float32),
            jax.ShapeDtypeStruct((1, 1), jnp.float32),
        ),
        grid_spec=pltpu.PrefetchScalarGridSpec(
            num_scalar_prefetch=1,  # [prev_min, prev_max] running observer state in SMEM
            grid=(1,),
            in_specs=[pl.BlockSpec((R, L), lambda i, p: (0, 0))],
            out_specs=(
                pl.BlockSpec((R, L), lambda i, p: (0, 0)),
                pl.BlockSpec((1, 1), lambda i, p: (0, 0)),
                pl.BlockSpec((1, 1), lambda i, p: (0, 0)),
                pl.BlockSpec((1, 1), lambda i, p: (0, 0)),
                pl.BlockSpec((1, 1), lambda i, p: (0, 0)),
            ),
        ),
        compiler_params=_compiler_params(("arbitrary",), vmem_limit),
        cost_estimate=pl.CostEstimate(
            flops=8 * x2d.size, transcendentals=0,
            bytes_accessed=2 * x2d.size * x2d.dtype.itemsize),
    )(prev_minmax, x2d)
    return y2d, mn[0, 0], mx[0, 0], scale[0, 0], zp[0, 0]


# ----------------------------------------------------------------------------- #
# QAct module (JAX wrapper reproducing the PyTorch forward control flow)
# ----------------------------------------------------------------------------- #
class QAct:
    def __init__(self, quant=False, calibrate=False, last_calibrate=False,
                 row_tile=None, allow_fused=True):
        """row_tile=None -> auto (generation-aware block size). Explicit override: multiple of 8."""
        self.quant = quant
        self.calibrate = calibrate
        self.last_calibrate = last_calibrate
        if row_tile is not None:
            assert row_tile % 8 == 0, "explicit row_tile must be a multiple of 8"
        self.row_tile = row_tile
        self.allow_fused = allow_fused
        (self._target_block_bytes, self._pipeline_vmem_limit,
         self._fused_vmem_limit, self._fused_max_bytes) = _tpu_generation_defaults()
        # observer state (minmax, layer_wise)
        self.min_val = None
        self.max_val = None
        # quantization params
        self.scale = None
        self.zero_point = None

    def _pick_row_tile(self, x2d):
        R, L = x2d.shape
        if self.row_tile is not None:
            return min(self.row_tile, R)
        return _choose_row_tile(R, L, x2d.dtype.itemsize, self._target_block_bytes)

    def _observer_update(self, x2d, row_tile):
        mn, mx = minmax_observe(x2d, row_tile,
                                pipeline_vmem_limit=self._pipeline_vmem_limit)
        if self.min_val is None:
            self.min_val, self.max_val = mn, mx
        else:
            self.min_val = jnp.minimum(self.min_val, mn)
            self.max_val = jnp.maximum(self.max_val, mx)

    def _update_quantization_params(self):
        eps = jnp.float32(jnp.finfo(jnp.float32).eps)
        scale = (self.max_val - self.min_val) / jnp.float32(QMAX - QMIN)
        scale = jnp.maximum(scale, eps)
        zero_point = jnp.float32(QMIN) - jnp.round(self.min_val / scale)
        zero_point = jnp.clip(zero_point, QMIN, QMAX)
        self.scale, self.zero_point = scale, zero_point

    def _prev_minmax(self):
        if self.min_val is None:
            return jnp.array([jnp.inf, -jnp.inf], dtype=jnp.float32)
        return jnp.stack([self.min_val, self.max_val]).astype(jnp.float32)

    def __call__(self, x):
        if not self.calibrate and not self.quant:
            return x  # pure identity path

        orig_shape = x.shape
        total = x.size
        x2d, pad = _lane_dense_2d(x)  # lane-dense 2D view (metadata reshape; pad only if needed)

        use_fused = (self.allow_fused and self.calibrate and self.last_calibrate
                     and self.quant
                     and x2d.size * x2d.dtype.itemsize <= self._fused_max_bytes)

        if use_fused:
            # Single pass: observer fold + scale/zp + fake-quant without re-reading HBM.
            y2d, mn, mx, scale, zp = fused_calibrate_quant(
                x2d, self._prev_minmax(), vmem_limit=self._fused_vmem_limit)
            self.min_val, self.max_val = mn, mx
            self.scale, self.zero_point = scale, zp
        else:
            row_tile = self._pick_row_tile(x2d)
            if self.calibrate:
                self._observer_update(x2d, row_tile)
                if self.last_calibrate:
                    self._update_quantization_params()
            if not self.quant:
                return x
            if self.scale is None or self.zero_point is None:
                raise RuntimeError("QAct: quant=True but quantization params not calibrated")
            y2d = fake_quant(x2d, self.scale, self.zero_point, row_tile,
                             pipeline_vmem_limit=self._pipeline_vmem_limit)

        if pad:
            return y2d.reshape(-1)[:total].reshape(orig_shape)
        return y2d.reshape(orig_shape)


# ----------------------------------------------------------------------------- #
# Pure-JAX reference for verification
# ----------------------------------------------------------------------------- #
def _ref_fakequant(x):
    mn = jnp.min(x).astype(jnp.float32)
    mx = jnp.max(x).astype(jnp.float32)
    eps = jnp.float32(jnp.finfo(jnp.float32).eps)
    scale = jnp.maximum((mx - mn) / (QMAX - QMIN), eps)
    zp = jnp.clip(QMIN - jnp.round(mn / scale), QMIN, QMAX)
    q = jnp.clip(jnp.round(x / scale + zp), QMIN, QMAX)
    return (q - zp) * scale


if __name__ == "__main__":
    key = jax.random.PRNGKey(0)
    k1, k2, k3, k4 = jax.random.split(key, 4)

    # 1) (B, N, C) activations; calibrate+quant in one call -> fused single-pass kernel.
    x = jax.random.normal(k1, (2, 8, 32), dtype=jnp.float32) * 3.0 + 0.5
    qact = QAct(quant=True, calibrate=True, last_calibrate=True)
    y = jax.block_until_ready(qact(x))
    y_ref = _ref_fakequant(x)
    assert y.shape == x.shape and y.dtype == x.dtype
    assert jnp.max(jnp.abs(y - y_ref)) < 1e-5, "mismatch vs reference (fused path)"

    # 2) Two-pass path with a masked tail block (lane-dense view (15, 256), tile 8).
    x2 = jax.random.normal(k2, (4, 10, 96), dtype=jnp.float32) * 2.0 - 1.0
    qact2 = QAct(quant=True, calibrate=True, last_calibrate=True, row_tile=8,
                 allow_fused=False)
    y2 = jax.block_until_ready(qact2(x2))
    assert y2.shape == x2.shape and y2.dtype == x2.dtype
    assert jnp.max(jnp.abs(y2 - _ref_fakequant(x2))) < 1e-5, "mismatch (two-pass, masked tail)"

    # 3) Multi-block observer exercising the 2-way parallel split + sub-slice streaming loop
    #    (lane-dense view (591, 128), tile 64 -> 10 blocks -> 2 splits of 5, masked last block).
    x3 = jax.random.normal(k3, (2, 197, 192), dtype=jnp.float32) * 1.7 + 0.3
    qact3 = QAct(quant=True, calibrate=True, last_calibrate=True, row_tile=64,
                 allow_fused=False)
    y3 = jax.block_until_ready(qact3(x3))
    assert jnp.max(jnp.abs(y3 - _ref_fakequant(x3))) < 1e-5, "mismatch (split observer)"

    # 4) numel % 128 != 0 -> lane-dense edge-padding fallback (pad processed, then sliced off).
    x4 = jax.random.normal(k4, (3, 6, 7), dtype=jnp.float32) * 4.0
    qact4 = QAct(quant=True, calibrate=True, last_calibrate=True)
    y4 = jax.block_until_ready(qact4(x4))
    assert y4.shape == x4.shape and y4.dtype == x4.dtype
    assert jnp.max(jnp.abs(y4 - _ref_fakequant(x4))) < 1e-5, "mismatch (padded fallback)"

    # 5) identity path (quant=False, no calibration) must return input unchanged.
    ident = QAct(quant=False, calibrate=False)
    z = jax.block_until_ready(ident(x))
    assert jnp.array_equal(z, x)

    print("KERNEL_OK")
</pallas_src>

<mosaic_0001>
module attributes {stable_mosaic.version = 11 : i64} {
  func.func @_fused_calib_quant_kernel(%arg0: i32, %arg1: memref<2xf32, #tpu.memory_space<smem>>, %arg2: memref<1x512xf32, #tpu.memory_space<vmem>>, %arg3: memref<1x512xf32, #tpu.memory_space<vmem>>, %arg4: memref<1x1xf32, #tpu.memory_space<vmem>>, %arg5: memref<1x1xf32, #tpu.memory_space<vmem>>, %arg6: memref<1x1xf32, #tpu.memory_space<vmem>>, %arg7: memref<1x1xf32, #tpu.memory_space<vmem>>) attributes {dimension_semantics = [#tpu.dimension_semantics<arbitrary>], iteration_bounds = array<i64: 1>, scalar_prefetch = 1 : i64, scratch_operands = 0 : i64, tpu.core_type = #tpu.core_type<tc>, window_params = [{pipeline_mode = #tpu.pipeline_mode<synchronous>, transform_indices = @transform_0, window_bounds = array<i64: 1, 512>}, {pipeline_mode = #tpu.pipeline_mode<synchronous>, transform_indices = @transform_1, window_bounds = array<i64: 1, 512>}, {pipeline_mode = #tpu.pipeline_mode<synchronous>, transform_indices = @transform_2, window_bounds = array<i64: 1, 1>}, {pipeline_mode = #tpu.pipeline_mode<synchronous>, transform_indices = @transform_3, window_bounds = array<i64: 1, 1>}, {pipeline_mode = #tpu.pipeline_mode<synchronous>, transform_indices = @transform_4, window_bounds = array<i64: 1, 1>}, {pipeline_mode = #tpu.pipeline_mode<synchronous>, transform_indices = @transform_5, window_bounds = array<i64: 1, 1>}]} {
    %c0 = arith.constant 0 : index
    %c0_0 = arith.constant 0 : index
    %0 = vector.load %arg2[%c0, %c0_0] : memref<1x512xf32, #tpu.memory_space<vmem>>, vector<1x512xf32>
    %1 = vector.shape_cast %0 : vector<1x512xf32> to vector<1x1x512xf32>
    %cst = arith.constant dense<0x7F800000> : vector<1xf32>
    %2 = vector.multi_reduction <minimumf>, %1, %cst [1, 2] : vector<1x1x512xf32> to vector<1xf32>
    %3 = vector.shape_cast %2 : vector<1xf32> to vector<1x1x1xf32>
    %4 = vector.extract %3[0, 0, 0] : f32 from vector<1x1x1xf32>
    %c0_1 = arith.constant 0 : index
    %5 = memref.load %arg1[%c0_1] : memref<2xf32, #tpu.memory_space<smem>>
    %6 = arith.minimumf %4, %5 : f32
    %7 = vector.shape_cast %0 : vector<1x512xf32> to vector<1x1x512xf32>
    %cst_2 = arith.constant dense<0xFF800000> : vector<1xf32>
    %8 = vector.multi_reduction <maximumf>, %7, %cst_2 [1, 2] : vector<1x1x512xf32> to vector<1xf32>
    %9 = vector.shape_cast %8 : vector<1xf32> to vector<1x1x1xf32>
    %10 = vector.extract %9[0, 0, 0] : f32 from vector<1x1x1xf32>
    %c1 = arith.constant 1 : index
    %11 = memref.load %arg1[%c1] : memref<2xf32, #tpu.memory_space<smem>>
    %12 = arith.maximumf %10, %11 : f32
    %13 = arith.subf %12, %6 : f32
    %cst_3 = arith.constant 2.550000e+02 : f32
    %14 = arith.divf %13, %cst_3 : f32
    %cst_4 = arith.constant 1.1920929E-7 : f32
    %15 = arith.maximumf %14, %cst_4 : f32
    %16 = arith.divf %6, %15 : f32
    %17 = math.roundeven %16 : f32
    %cst_5 = arith.constant -1.280000e+02 : f32
    %18 = arith.subf %cst_5, %17 : f32
    %cst_6 = arith.constant -1.280000e+02 : f32
    %cst_7 = arith.constant 1.270000e+02 : f32
    %19 = arith.maximumf %cst_6, %18 : f32
    %20 = arith.minimumf %cst_7, %19 : f32
    %21 = vector.broadcast %15 : f32 to vector<1x512xf32>
    %22 = arith.divf %0, %21 : vector<1x512xf32>
    %23 = vector.broadcast %20 : f32 to vector<1x512xf32>
    %24 = arith.addf %22, %23 : vector<1x512xf32>
    %25 = math.roundeven %24 : vector<1x512xf32>
    %cst_8 = arith.constant -1.280000e+02 : f32
    %cst_9 = arith.constant 1.270000e+02 : f32
    %26 = vector.broadcast %cst_8 : f32 to vector<1x512xf32>
    %27 = arith.maximumf %26, %25 : vector<1x512xf32>
    %28 = vector.broadcast %cst_9 : f32 to vector<1x512xf32>
    %29 = arith.minimumf %28, %27 : vector<1x512xf32>
    %30 = vector.broadcast %20 : f32 to vector<1x512xf32>
    %31 = arith.subf %29, %30 : vector<1x512xf32>
    %32 = vector.broadcast %15 : f32 to vector<1x512xf32>
    %33 = arith.mulf %31, %32 : vector<1x512xf32>
    %c0_10 = arith.constant 0 : index
    %c0_11 = arith.constant 0 : index
    %34 = vector.load %arg3[%c0_10, %c0_11] : memref<1x512xf32, #tpu.memory_space<vmem>>, vector<1x512xf32>
    tpu.vector_store %arg3[%c0_10, %c0_11], %33 {strides = array<i32>} : memref<1x512xf32, #tpu.memory_space<vmem>>, vector<1x512xf32>,
    %35 = vector.broadcast %6 : f32 to vector<1x1xf32>
    %c0_12 = arith.constant 0 : index
    %c0_13 = arith.constant 0 : index
    %36 = vector.load %arg4[%c0_12, %c0_13] : memref<1x1xf32, #tpu.memory_space<vmem>>, vector<1x1xf32>
    tpu.vector_store %arg4[%c0_12, %c0_13], %35 {strides = array<i32>} : memref<1x1xf32, #tpu.memory_space<vmem>>, vector<1x1xf32>,
    %37 = vector.broadcast %12 : f32 to vector<1x1xf32>
    %c0_14 = arith.constant 0 : index
    %c0_15 = arith.constant 0 : index
    %38 = vector.load %arg5[%c0_14, %c0_15] : memref<1x1xf32, #tpu.memory_space<vmem>>, vector<1x1xf32>
    tpu.vector_store %arg5[%c0_14, %c0_15], %37 {strides = array<i32>} : memref<1x1xf32, #tpu.memory_space<vmem>>, vector<1x1xf32>,
    %39 = vector.broadcast %15 : f32 to vector<1x1xf32>
    %c0_16 = arith.constant 0 : index
    %c0_17 = arith.constant 0 : index
    %40 = vector.load %arg6[%c0_16, %c0_17] : memref<1x1xf32, #tpu.memory_space<vmem>>, vector<1x1xf32>
    tpu.vector_store %arg6[%c0_16, %c0_17], %39 {strides = array<i32>} : memref<1x1xf32, #tpu.memory_space<vmem>>, vector<1x1xf32>,
    %41 = vector.broadcast %20 : f32 to vector<1x1xf32>
    %c0_18 = arith.constant 0 : index
    %c0_19 = arith.constant 0 : index
    %42 = vector.load %arg7[%c0_18, %c0_19] : memref<1x1xf32, #tpu.memory_space<vmem>>, vector<1x1xf32>
    tpu.vector_store %arg7[%c0_18, %c0_19], %41 {strides = array<i32>} : memref<1x1xf32, #tpu.memory_space<vmem>>, vector<1x1xf32>,
    return
  }
  func.func @transform_0(%arg0: i32, %arg1: memref<2xf32, #tpu.memory_space<smem>>) -> (i32, i32) {
    %c0_i32 = arith.constant 0 : i32
    %c0_i32_0 = arith.constant 0 : i32
    %c0_i32_1 = arith.constant 0 : i32
    return %c0_i32, %c0_i32_0 : i32, i32
  }
  func.func @transform_1(%arg0: i32, %arg1: memref<2xf32, #tpu.memory_space<smem>>) -> (i32, i32) {
    %c0_i32 = arith.constant 0 : i32
    %c0_i32_0 = arith.constant 0 : i32
    %c0_i32_1 = arith.constant 0 : i32
    return %c0_i32, %c0_i32_0 : i32, i32
  }
  func.func @transform_2(%arg0: i32, %arg1: memref<2xf32, #tpu.memory_space<smem>>) -> (i32, i32) {
    %c0_i32 = arith.constant 0 : i32
    %c0_i32_0 = arith.constant 0 : i32
    %c0_i32_1 = arith.constant 0 : i32
    return %c0_i32, %c0_i32_0 : i32, i32
  }
  func.func @transform_3(%arg0: i32, %arg1: memref<2xf32, #tpu.memory_space<smem>>) -> (i32, i32) {
    %c0_i32 = arith.constant 0 : i32
    %c0_i32_0 = arith.constant 0 : i32
    %c0_i32_1 = arith.constant 0 : i32
    return %c0_i32, %c0_i32_0 : i32, i32
  }
  func.func @transform_4(%arg0: i32, %arg1: memref<2xf32, #tpu.memory_space<smem>>) -> (i32, i32) {
    %c0_i32 = arith.constant 0 : i32
    %c0_i32_0 = arith.constant 0 : i32
    %c0_i32_1 = arith.constant 0 : i32
    return %c0_i32, %c0_i32_0 : i32, i32
  }
  func.func @transform_5(%arg0: i32, %arg1: memref<2xf32, #tpu.memory_space<smem>>) -> (i32, i32) {
    %c0_i32 = arith.constant 0 : i32
    %c0_i32_0 = arith.constant 0 : i32
    %c0_i32_1 = arith.constant 0 : i32
    return %c0_i32, %c0_i32_0 : i32, i32
  }
}

</mosaic_0001>

<bundles_post_ra>
// kernel: tpu_custom_call.1
= control target key start
LH: loop header
LB: loop body
LE: loop exit
PB: predicated region body
PF: predicated region fallthrough
CT: control target
= control target key end

     0   :  { %s533_s0 = inlined_call_operand.hbm [shape: f32[2], index: 0, kind: input, shape index: {}]   ;;  %s534_s1 = inlined_call_operand.hbm [shape: f32[1,512], index: 1, kind: input, shape index: {}]   ;;  %s535_s2 = inlined_call_operand.hbm [shape: f32[1,512], index: 2, kind: output, shape index: {0}]   ;;  %s536_s3 = inlined_call_operand.hbm [shape: f32[1,1], index: 3, kind: output, shape index: {1}]   ;;  %s537_s4 = inlined_call_operand.hbm [shape: f32[1,1], index: 4, kind: output, shape index: {2}]   ;;  %s538_s5 = inlined_call_operand.hbm [shape: f32[1,1], index: 5, kind: output, shape index: {3}]   ;;  %s539_s6 = inlined_call_operand.hbm [shape: f32[1,1], index: 6, kind: output, shape index: {4}]  }
   0x1   :  { %s223_s23 = scalar_lea.hbm %s533_s0, 16 }
   0x2   :  { %p224_p0 = scmp.ne.s32.totalorder %s533_s0, %s223_s23  ;;  %p227_p1 = scmp.lt.u32.totalorder %s223_s23, %s533_s0 }
   0x4   :  { %p229_p2 = pnand %p227_p1, %p224_p0 }
   0x6   :  { %232 = shalt.err (!%p229_p2)  }
   0x7   :  { %s375_s28 = smov [#allocation3]  }
   0x8   :  { %13 = dma.hbm_to_smem %s533_s0, 16, %s375_s28, [#allocation2] }
   0x9   :  { %365 = dma.done.wait [#allocation2], 16 }
   0xa   :  { %366 = vsyncadd [#allocation2], 4294967280 }
   0xb   :  { %15 = sfence }
   0xc   :  { %16 = vsyncpa [#allocation5], 0 }
   0xd   :  { %17 = vsyncpa [#allocation6], 0 }
   0xe   :  { %18 = vsyncpa [#allocation9], 0 }
   0xf   :  { %19 = vsyncpa [#allocation12], 0  ;;  %s376_s7 = smov [#allocation4]   ;;  %s233_s11 = scalar_lea.hbm %s534_s1, 64 }
  0x10   :  { %s26_s8 = sshll.u32 %s376_s7, 4  ;;  %p234_p3 = scmp.ne.s32.totalorder %s534_s1, %s233_s11  ;;  %s27_s8 = int_to_ptr.vmem [resolvable:$true] %s26_s8 }
  0x11   :  { %p237_p4 = scmp.lt.u32.totalorder %s233_s11, %s534_s1 }
  0x13   :  { %p239_p5 = pnand %p237_p4, %p234_p3 }
  0x15   :  { %242 = shalt.err (!%p239_p5)
}
  0x16   :  { %s243_s15 = scalar_lea.vmem %s27_s8, 64  ;;  %p248_p7 = scmp.lt.s32.totalorder %s27_s8, %s27_s8 }
  0x17   :  { %p244_p6 = scmp.ne.s32.totalorder %s27_s8, %s243_s15  ;;  %p249_p8 = scmp.lt.s32.totalorder %s243_s15, %s243_s15 }
  0x19   :  { %p250_p9 = por %p249_p8, %p248_p7 }
  0x1b   :  { %p251_p10 = pnand %p250_p9, %p244_p6 }
  0x1d   :  { %254 = shalt.err (!%p251_p10)
}
  0x1e   :  { %29 = dma.hbm_to_vmem [thread:$0]  %s534_s1, 64, %s27_s8, [#allocation5]  }
  0x1f   :  { %367 = dma.done.wait [#allocation5], 64  }
  0x20   :  { %368 = vsyncadd [#allocation5], 4294967232  ;;  %v35_v0 = vlaneseq  ;;  %v445_v6 = vld [vmem:[#allocation4] sm:$0xf]  ;;  %vm55_vm0 = vcmask 1040384   ;;  %s72_s1 = sld [smem:[#allocation3]] }
  0x21   :  { %s203_s18 = sld [smem:[#allocation3 + $0x1]]  ;;  %vm128_vm1 = vcmask 0   ;;  %s377_s21 = smov [#allocation8]  }
  0x22   :  { %v36_v1 = vshrl.u32 %v35_v0, 7  ;;  %s150_s22 = sshll.u32 %s377_s21, 4  ;;  %s378_s23 = smov [#allocation10]   ;;  %s151_s22 = int_to_ptr.vmem [resolvable:$true] %s150_s22 }
  0x23   :  { %s160_s24 = sshll.u32 %s378_s23, 4  ;;  %s379_s27 = smov [#allocation11]   ;;  %s458_s24 = int_to_ptr.vmem [resolvable:$true] %s160_s24 }
  0x24   :  { %v37_v2 = vsub.s32 0, %v36_v1  ;;  %v41_v3 = vsub.s32 1, %v36_v1  ;;  %v45_v4 = vsub.s32 2, %v36_v1  ;;  %v49_v5 = vsub.s32 3, %v36_v1  ;;  %s455_s28 = sshll.u32 %s379_s27, 4  ;;  %s255_s30 = scalar_lea.vmem %s151_s22, 16  ;;  %s171_s28 = int_to_ptr.vmem [resolvable:$true] %s455_s28 }
  0x25   :  { %p256_p11 = scmp.ne.s32.totalorder %s151_s22, %s255_s30  ;;  %s259_s7 = scalar_lea.vmem %s151_s22, 32 }
  0x26   :  { %v38_v7 = vrot.slane %v445_v6, %v37_v2  ;;  %v42_v8 = vrot.slane %v445_v6, %v41_v3  ;;  %v46_v9 = vrot.slane %v445_v6, %v45_v4  ;;  %v50_v10 = vrot.slane %v445_v6, %v49_v5  ;;  %p260_p12 = scmp.lt.s32.totalorder %s151_s22, %s151_s22  ;;  %p261_p13 = scmp.lt.s32.totalorder %s259_s7, %s255_s30 }
  0x28   :  { %v56_v11 = vsel %vm55_vm0, %v38_v7, inf  ;;  %v57_v12 = vsel %vm55_vm0, %v42_v8, inf  ;;  %v58_v13 = vsel %vm55_vm0, %v46_v9, inf  ;;  %v59_v14 = vsel %vm55_vm0, %v50_v10, inf  ;;  %p262_p0 = por %p261_p13, %p260_p12 }
  0x29   :  { %v60_v15 = vmin.f32 %v56_v11, %v57_v12  ;;  %v61_v16 = vmin.f32 %v58_v13, %v59_v14  ;;  %v74_v17 = vsel %vm55_vm0, %v38_v7, -inf  ;;  %v75_v18 = vsel %vm55_vm0, %v42_v8, -inf }
  0x2a   :  { %v76_v19 = vsel %vm55_vm0, %v46_v9, -inf  ;;  %v77_v20 = vsel %vm55_vm0, %v50_v10, -inf  ;;  %v78_v21 = vmax.f32 %v74_v17, %v75_v18  ;;  %p263_p1 = pnand %p262_p0, %p256_p11 }
  0x2b   :  { %v62_v22 = vmin.f32 %v60_v15, %v61_v16  ;;  %v79_v23 = vmax.f32 %v76_v19, %v77_v20 }
  0x2d   :  { %63 = vmin.xlane.f32.xlu0 %v62_v22  ;;  %v80_v24 = vmax.f32 %v78_v21, %v79_v23 }
  0x31   :  { %81 = vmax.xlane.f32.xlu0 %v80_v24 }
  0xba   :  { %v64_v25 = vpop.xlane.xlu0 %63 }
  0xbb   :  { %v65_v26 = vrot.slane %v64_v25, 4 }
  0xbd   :  { %v66_v27 = vmin.f32 %v64_v25, %v65_v26 }
  0xbe   :  { %v82_v28 = vpop.xlane.xlu0 %81 }
  0xbf   :  { %v67_v29 = vrot.slane %v66_v27, 2  ;;  %v83_v30 = vrot.slane %v82_v28, 4 }
  0xc1   :  { %v84_v31 = vmax.f32 %v82_v28, %v83_v30  ;;  %v68_v32 = vmin.f32 %v66_v27, %v67_v29 }
  0xc3   :  { %v85_v33 = vrot.slane %v84_v31, 2  ;;  %v69_v34 = vrot.slane %v68_v32, 1 }
  0xc5   :  { %v86_v35 = vmax.f32 %v84_v31, %v85_v33  ;;  %v70_v36 = vmin.f32 %v68_v32, %v69_v34 }
  0xc7   :  { %204 = vpush %v70_v36  ;;  %v87_v37 = vrot.slane %v86_v35, 1 }
  0xc9   :  { %v88_v38 = vmax.f32 %v86_v35, %v87_v37 }
  0xcb   :  { %206 = vpush %v88_v38 }
  0xf8   :  { %s205_s19 = spop %204 }
  0xf9   :  { %s451_s20 = smin.f32 %s205_s19, %s72_s1 }
  0xfa   :  { %v127_v39 = vstv %s451_s20 }
  0xfb   :  { %129 = vst.msk [vmem:[#allocation8] sm:$0x1] %vm128_vm1, %v127_v39 }
  0xfc   :  { %s207_s25 = spop %206 }
  0xfd   :  { %s91_s26 = smax.f32 %s207_s25, %s203_s18 }
  0xfe   :  { %s92_s29 = ssub.f32 %s91_s26, %s451_s20  ;;  %v130_v40 = vstv %s91_s26 }
  0xff   :  { %266 = shalt.err (!%p263_p1)
}
 0x100   :  { %s267_s10 = scalar_lea.hbm %s536_s3, 16 }
 0x101   :  { %p268_p2 = scmp.ne.s32.totalorder %s536_s3, %s267_s10  ;;  %p271_p3 = scmp.lt.u32.totalorder %s267_s10, %s536_s3 }
 0x103   :  { %p273_p4 = pnand %p271_p3, %p268_p2 }
 0x105   :  { %276 = shalt.err (!%p273_p4)
}
 0x106   :  { %153 = dma.vmem_to_hbm [thread:$0]  %s151_s22, 16, %s536_s3, [#allocation9]   ;;  %131 = vst.msk [vmem:[#allocation10] sm:$0x1] %vm128_vm1, %v130_v40 }
 0x107   :  { %s95_s16 = smul.f32 0.003921569, %s92_s29  ;;  %s277_s17 = scalar_lea.vmem %s458_s24, 16 }
 0x108   :  { %p278_p5 = scmp.ne.s32.totalorder %s458_s24, %s277_s17  ;;  %s281_s1 = scalar_lea.vmem %s458_s24, 32 }
 0x109   :  { %p282_p6 = scmp.lt.s32.totalorder %s458_s24, %s458_s24  ;;  %p283_p7 = scmp.lt.s32.totalorder %s281_s1, %s277_s17 }
 0x10b   :  { %p284_p8 = por %p283_p7, %p282_p6 }
 0x10d   :  { %p285_p9 = pnand %p284_p8, %p278_p5 }
 0x10f   :  { %288 = shalt.err (!%p285_p9)
}
 0x110   :  { %s289_s21 = scalar_lea.hbm %s537_s4, 16 }
 0x111   :  { %p290_p10 = scmp.ne.s32.totalorder %s537_s4, %s289_s21  ;;  %p293_p11 = scmp.lt.u32.totalorder %s289_s21, %s537_s4 }
 0x113   :  { %p295_p12 = pnand %p293_p11, %p290_p10 }
 0x115   :  { %298 = shalt.err (!%p295_p12)
}
 0x116   :  { %163 = dma.vmem_to_hbm [thread:$0]  %s458_s24, 16, %s537_s4, [#allocation9]  }
 0x117   :  { %s380_s29 = smov 1.1920929e-07   ;;  %s299_s7 = scalar_lea.vmem %s171_s28, 16 }
 0x118   :  { %s96_s30 = smax.f32 %s380_s29, %s95_s16  ;;  %p300_p13 = scmp.ne.s32.totalorder %s171_s28, %s299_s7 }
 0x119   :  { %v97_v41 = vstv %s96_s30  ;;  %s303_s8 = scalar_lea.vmem %s171_s28, 32  ;;  %p304_p0 = scmp.lt.s32.totalorder %s171_s28, %s171_s28 }
 0x11a   :  { %221 = vrcp.f32 %v97_v41  ;;  %132 = vst.msk [vmem:[#allocation11] sm:$0x1] %vm128_vm1, %v97_v41  ;;  %p305_p1 = scmp.lt.s32.totalorder %s303_s8, %s299_s7 }
 0x11c   :  { %p306_p2 = por %p305_p1, %p304_p0 }
 0x11e   :  { %p307_p3 = pnand %p306_p2, %p300_p13 }
 0x120   :  { %310 = shalt.err (!%p307_p3)
}
 0x121   :  { %s311_s11 = scalar_lea.hbm %s538_s5, 16 }
 0x122   :  { %p312_p4 = scmp.ne.s32.totalorder %s538_s5, %s311_s11  ;;  %p315_p5 = scmp.lt.u32.totalorder %s311_s11, %s538_s5 }
 0x124   :  { %p317_p6 = pnand %p315_p5, %p312_p4 }
 0x126   :  { %320 = shalt.err (!%p317_p6)
}
 0x127   :  { %173 = dma.vmem_to_hbm [thread:$0]  %s171_s28, 16, %s538_s5, [#allocation12]   ;;  %v222_v42 = vpop.eup %221 }
 0x128   :  { %208 = vpush %v222_v42  ;;  %s381_s3 = smov [#allocation13]   ;;  %s382_s26 = smov -128.0   ;;  %v114_v43 = vmul.f32 %v222_v42, %v445_v6 }
 0x129   :  { %s180_s22 = sshll.u32 %s381_s3, 4  ;;  %s383_s29 = smov 127.0   ;;  %s181_s22 = int_to_ptr.vmem [resolvable:$true] %s180_s22 }
 0x12a   :  { %s321_s5 = scalar_lea.vmem %s181_s22, 16  ;;  %p326_p9 = scmp.lt.s32.totalorder %s181_s22, %s181_s22 }
 0x12b   :  { %p322_p8 = scmp.ne.s32.totalorder %s181_s22, %s321_s5 }
 0x159   :  { %s209_s15 = spop %208 }
 0x15a   :  { %s100_s16 = smul.f32 %s209_s15, %s451_s20  ;;  %s325_s20 = scalar_lea.vmem %s181_s22, 32 }
 0x15b   :  { %p327_p10 = scmp.lt.s32.totalorder %s325_s20, %s321_s5 }
 0x15c   :  { %s101_s17 = scvt.f32.s32 %s100_s16  ;;  %s106_s1 = sand.u32 2147483647, %s100_s16 }
 0x15d   :  { %s104_s19 = sand.u32 2147483648, %s100_s16  ;;  %p107_p7 = scmp.lt.f32.partialorder %s106_s1, 2.1474836e+09 }
 0x15e   :  { %s102_s18 = scvt.s32.f32 %s101_s17  ;;  %p328_p11 = por %p327_p10, %p326_p9 }
 0x160   :  { %s103_s21 = sand.u32 2147483647, %s102_s18  ;;  %p329_p12 = pnand %p328_p11, %p322_p8 }
 0x161   :  { %s105_s23 = sor.u32 %s104_s19, %s103_s21 }
 0x162   :  { %s541_s23 = smov (!%p107_p7, %s105_s23), %s100_s16 }
 0x163   :  { %s109_s25 = ssub.f32 -128.0, %s541_s23 }
 0x165   :  { %s110_s27 = smax.f32 %s382_s26, %s109_s25 }
 0x166   :  { %s111_s30 = smin.f32 %s383_s29, %s110_s27 }
 0x167   :  { %v115_v44 = vstv %s111_s30 }
 0x168   :  { %v116_v45 = vadd.f32 %v115_v44, %v114_v43  ;;  %133 = vst.msk [vmem:[#allocation13] sm:$0x1] %vm128_vm1, %v115_v44 }
 0x169   :  { %332 = shalt.err (!%p329_p12)
}
 0x16a   :  { %s333_s8 = scalar_lea.hbm %s539_s6, 16 }
 0x16b   :  { %p334_p13 = scmp.ne.s32.totalorder %s539_s6, %s333_s8  ;;  %p337_p0 = scmp.lt.u32.totalorder %s333_s8, %s539_s6 }
 0x16d   :  { %p339_p1 = pnand %p337_p0, %p334_p13 }
 0x16f   :  { %342 = shalt.err (!%p339_p1)
}
 0x170   :  { %183 = dma.vmem_to_hbm [thread:$0]  %s181_s22, 16, %s539_s6, [#allocation12]   ;;  %v210_v46 = vround.rtne.f32 %v116_v45  ;;  %vm124_vm2 = vcmp.lt.s32.totalorder %v35_v0, 512 }
 0x171   :  { %s384_s13 = smov [#allocation7]  }
 0x172   :  { %v118_v47 = vmax.f32 %v210_v46, -128.0  ;;  %s140_s14 = sshll.u32 %s384_s13, 4  ;;  %s141_s14 = int_to_ptr.vmem [resolvable:$true] %s140_s14 }
 0x173   :  { %s343_s0 = scalar_lea.vmem %s141_s14, 64  ;;  %p348_p3 = scmp.lt.s32.totalorder %s141_s14, %s141_s14 }
 0x174   :  { %v119_v48 = vmin.f32 %v118_v47, 127.0  ;;  %p344_p2 = scmp.ne.s32.totalorder %s141_s14, %s343_s0  ;;  %p349_p4 = scmp.lt.s32.totalorder %s343_s0, %s343_s0 }
 0x176   :  { %v120_v49 = vsub.f32 %v119_v48, %v115_v44  ;;  %p350_p5 = por %p349_p4, %p348_p3 }
 0x178   :  { %v121_v50 = vmul.f32 %v120_v49, %v97_v41  ;;  %p351_p6 = pnand %p350_p5, %p344_p2 }
 0x17a   :  { %126 = vst.msk [vmem:[#allocation7] sm:$0xf] %vm124_vm2, %v121_v50 }
 0x17b   :  { %354 = shalt.err (!%p351_p6)
}
 0x17c   :  { %s355_s16 = scalar_lea.hbm %s535_s2, 64 }
 0x17d   :  { %p356_p7 = scmp.ne.s32.totalorder %s535_s2, %s355_s16  ;;  %p359_p8 = scmp.lt.u32.totalorder %s355_s16, %s535_s2 }
 0x17f   :  { %p361_p9 = pnand %p359_p8, %p356_p7 }
 0x181   :  { %364 = shalt.err (!%p361_p9)
}
 0x182   :  { %143 = dma.vmem_to_hbm [thread:$0]  %s141_s14, 64, %s535_s2, [#allocation6]  }
 0x183   :  { %369 = dma.done.wait [#allocation6], 64  }
 0x184   :  { %370 = vsyncadd [#allocation6], 4294967232 }
 0x185   :  { %371 = dma.done.wait [#allocation9], 32  }
 0x186   :  { %372 = vsyncadd [#allocation9], 4294967264 }
 0x187   :  { %373 = dma.done.wait [#allocation12], 32  }
 0x188   :  { %374 = vsyncadd [#allocation12], 4294967264 }
 0x189   :  { %199 = vsyncpa [#allocation5], 1 }
 0x18a   :  { %200 = vsyncpa [#allocation6], 1 }
 0x18b   :  { %201 = vsyncpa [#allocation9], 1 }
 0x18c   :  { %202 = vsyncpa [#allocation12], 1 }

</bundles_post_ra>
